<compile_context>
chip_gen: v6e
topology: v6e:2x2x1
jax: 0.10.0
libtpu: 0.0.40
codegen_flags: <defaults>
</compile_context>

<pallas_src>
import functools

import numpy as np
import jax
import jax.numpy as jnp
from jax.experimental import pallas as pl
from jax.experimental.pallas import tpu as pltpu

_LANE = 128
_VMEM_TILE_BUDGET = 20 * 1024 * 1024   # target working set (fits default scoped VMEM)


def _round_up(x, m):
    return ((x + m - 1) // m) * m


@functools.lru_cache(maxsize=None)
def _vmem_limit_bytes():
    """Scoped VMEM limit per generation: ~96 MiB on v5e/v6e (128 MiB), ~48 MiB on v7x."""
    try:
        cap = int(pltpu.get_tpu_info().vmem_capacity_bytes)
    except Exception:
        cap = 64 * 1024 * 1024
    return min(96 * 1024 * 1024, (3 * cap) // 4)


def _mm_kernel(*refs, nsteps, has_bias, use_acc):
    """One (tm x tk) @ (tk x Nc) step of a K-tiled matmul.

    refs = (a_ref, b_ref, [bias_ref], o_ref, [acc_ref])
    """
    idx = 0
    a_ref = refs[idx]; idx += 1
    b_ref = refs[idx]; idx += 1
    bias_ref = None
    if has_bias:
        bias_ref = refs[idx]; idx += 1
    o_ref = refs[idx]; idx += 1
    acc_ref = refs[idx] if use_acc else None

    # Cast at the MXU feed (cheap VPU work) -- avoids a wrapper-side HBM cast
    # pass over the big operand; no-op if the operand is already bf16.
    a = a_ref[...].astype(jnp.bfloat16)
    b = b_ref[...].astype(jnp.bfloat16)
    part = jnp.dot(a, b, preferred_element_type=jnp.float32)

    if nsteps == 1:
        # Fast path: single K step -> write straight through (no init / copy).
        if has_bias:
            part = part + bias_ref[...]
        o_ref[...] = part.astype(o_ref.dtype)
        return

    k = pl.program_id(1)
    # f32 outputs accumulate directly into the resident output block; bf16
    # outputs go through an f32 VMEM scratch.
    acc = acc_ref if use_acc else o_ref

    @pl.when(k == 0)
    def _():
        acc[...] = part           # first step writes (no zero-init pass)

    @pl.when(k != 0)
    def _():
        acc[...] += part

    if use_acc or has_bias:
        @pl.when(k == nsteps - 1)
        def _():
            res = acc[...]
            if has_bias:
                res = res + bias_ref[...]   # fused bias epilogue
            o_ref[...] = res.astype(o_ref.dtype)


def _pallas_matmul(a, b, *, bias=None, out_dtype=jnp.float32, tm=512, tk=None):
    """a [M, K] @ b [K, Nc] (+ bias) -> [M, Nc], f32 accumulation on the MXU.

    * Operands are DMA'd in their stored dtype and cast to bf16 in-kernel.
    * Nc must already be lane-dense (multiple of 128) -- callers pad the small
      feature operand, never the big N x N adjacency.
    * tk=None: keep the whole (K, Nc) B operand VMEM-resident when it fits
      (single K step, B fetched once, no K padding of A); otherwise stream K.
    """
    M, K = a.shape
    K2, Nc = b.shape
    assert K == K2, "contraction dims must match"
    assert Nc % _LANE == 0, "caller must pad the feature dim to a multiple of 128"

    a_item = a.dtype.itemsize
    b_item = b.dtype.itemsize
    out_item = np.dtype(out_dtype).itemsize
    has_bias = bias is not None

    def working_set(tm_, tk_, nk_):
        use_acc_ = (out_dtype != jnp.float32) and nk_ > 1
        u = (2 * tm_ * tk_ * a_item        # A tiles (double-buffered)
             + 2 * tk_ * Nc * b_item       # B stripe (double-buffered)
             + 2 * tm_ * Nc * out_item)    # output tiles
        if use_acc_:
            u += tm_ * Nc * 4
        if has_bias:
            u += 2 * Nc * 4
        return u

    # --- row tile: multiple of 16 (bf16 sublane packing) ---------------------
    tm = _round_up(max(16, min(tm, _round_up(M, 16))), 16)
    # v7x has 2 TensorCores: keep >= 2 blocks on the "parallel" axis when that
    # costs no extra padding (harmless on single-TC v5e/v6e).
    if tm >= M and M >= 256 and (M // 2) % 16 == 0:
        tm = M // 2

    # --- contraction tile -----------------------------------------------------
    want_resident = (tk is None) or (tk >= K)
    resident = want_resident and working_set(tm, K, 1) <= _VMEM_TILE_BUDGET
    if want_resident and not resident:
        tm_try = tm
        while tm_try > 64:
            tm_try = _round_up(max(64, tm_try // 2), 16)
            if working_set(tm_try, K, 1) <= _VMEM_TILE_BUDGET:
                tm, resident = tm_try, True
                break

    if resident:
        tk_eff, Kp, gk = K, K, 1          # block dim == array dim: no K padding needed
    else:
        tk_eff = tk if tk is not None else 512      # >= 512 amortizes the acc RMW (v5e)
        tk_eff = max(_LANE, min(_round_up(tk_eff, _LANE), _round_up(K, _LANE)))
        while tk_eff > _LANE and working_set(tm, tk_eff, 2) > _VMEM_TILE_BUDGET:
            tk_eff = max(_LANE, _round_up(tk_eff // 2, _LANE))
        while tm > 16 and working_set(tm, tk_eff, 2) > _VMEM_TILE_BUDGET:
            tm = _round_up(max(16, tm // 2), 16)
        Kp = _round_up(K, tk_eff)
        gk = Kp // tk_eff

    gm = pl.cdiv(M, tm)
    Mp = gm * tm
    use_acc = (out_dtype != jnp.float32) and gk > 1

    # Zero padding (contraction zeros contribute 0; extra rows are sliced off).
    # For well-shaped graphs (N multiple of 16, resident B) no pad is created.
    # TODO(synk): handle a ragged last row tile with a masked store instead of
    # materializing a padded copy of a large operand.
    if Mp != M or Kp != K:
        a = jnp.pad(a, ((0, Mp - M), (0, Kp - K)))
    if Kp != K:
        b = jnp.pad(b, ((0, Kp - K), (0, 0)))

    inputs = [a, b]
    in_specs = [
        pl.BlockSpec((tm, tk_eff), lambda i, k: (i, k)),
        pl.BlockSpec((tk_eff, Nc), lambda i, k: (k, 0)),   # constant over i when gk==1
    ]
    if has_bias:
        inputs.append(bias)
        in_specs.append(pl.BlockSpec((1, Nc), lambda i, k: (0, 0)))

    scratch_shapes = [pltpu.VMEM((tm, Nc), jnp.float32)] if use_acc else []

    kernel = functools.partial(_mm_kernel, nsteps=gk, has_bias=has_bias,
                               use_acc=use_acc)

    flops = 2 * Mp * Kp * Nc
    b_reads = 1 if gk == 1 else gm
    bytes_accessed = (Mp * Kp * a_item + Kp * Nc * b_item * b_reads
                      + Mp * Nc * out_item + (Nc * 4 if has_bias else 0))

    out = pl.pallas_call(
        kernel,
        out_shape=jax.ShapeDtypeStruct((Mp, Nc), out_dtype),
        grid_spec=pltpu.PrefetchScalarGridSpec(
            num_scalar_prefetch=0,
            grid=(gm, gk),                                     # reduction axis last
            in_specs=in_specs,
            out_specs=pl.BlockSpec((tm, Nc), lambda i, k: (i, 0)),  # resident over k
            scratch_shapes=scratch_shapes,
        ),
        compiler_params=pltpu.CompilerParams(
            dimension_semantics=("parallel", "arbitrary"),
            vmem_limit_bytes=_vmem_limit_bytes(),
        ),
        cost_estimate=pl.CostEstimate(
            flops=flops, transcendentals=0, bytes_accessed=bytes_accessed),
    )(*inputs)
    return out[:M] if Mp != M else out


@functools.partial(jax.jit, static_argnames=("tm", "tk"))
def graph_conv(adj, x, w, bias=None, *, tm=512, tk=None):
    """GraphConv forward (eval mode).

    adj : [N, N] float32 dense adjacency (read as stored; cast to bf16 in-kernel)
    x   : [N, in_dim] node features
    w   : [out_dim, in_dim]  (PyTorch nn.Linear weight layout)
    bias: optional [out_dim]
    Returns [N, out_dim] float32.
    """
    N, in_dim = x.shape
    out_dim = w.shape[0]

    # Dropout: eval mode => identity.
    # TODO(synk): training-mode dropout via pltpu.prng_seed / pltpu.prng_random_bits.

    # Lane-dense feature width: pad the *small* operands (W / x) to a multiple
    # of 128 so every kernel output is stored with full, unmasked lanes.
    out_dim_p = _round_up(out_dim, _LANE)
    w_t = w.T                                          # [in_dim, out_dim]
    if out_dim_p != out_dim:
        w_t = jnp.pad(w_t, ((0, 0), (0, out_dim_p - out_dim)))
    bias_p = None
    if bias is not None:
        bias_p = jnp.pad(bias.astype(jnp.float32)[None, :],
                         ((0, 0), (0, out_dim_p - out_dim)))

    if out_dim <= in_dim:
        # Algebraic reorder: adj @ (x @ W^T) -> the big N x N matmul streams the
        # smaller matrix.  Intermediate emitted directly as bf16 (no f32 round trip).
        xw = _pallas_matmul(x, w_t, out_dtype=jnp.bfloat16, tm=tm, tk=tk)
        out = _pallas_matmul(adj, xw, bias=bias_p, out_dtype=jnp.float32,
                             tm=tm, tk=tk)
    else:
        in_dim_p = _round_up(in_dim, _LANE)
        x_p = x if in_dim_p == in_dim else jnp.pad(x, ((0, 0), (0, in_dim_p - in_dim)))
        w_t_p = (w_t if in_dim_p == in_dim
                 else jnp.pad(w_t, ((0, in_dim_p - in_dim), (0, 0))))
        h = _pallas_matmul(adj, x_p, out_dtype=jnp.bfloat16, tm=tm, tk=tk)
        out = _pallas_matmul(h, w_t_p, bias=bias_p, out_dtype=jnp.float32,
                             tm=tm, tk=tk)

    if out_dim_p != out_dim:
        out = out[:, :out_dim]
    # activation defaults to None in the module => identity.
    return out


def xavier_uniform(key, out_dim, in_dim, dtype=jnp.float32):
    # matches nn.init.xavier_uniform_ on an (out_dim, in_dim) Linear weight
    bound = (6.0 / (in_dim + out_dim)) ** 0.5
    return jax.random.uniform(key, (out_dim, in_dim), dtype,
                              minval=-bound, maxval=bound)


if __name__ == "__main__":
    key = jax.random.PRNGKey(0)
    k_adj, k_x, k_w1, k_w2, k_w3, k_b = jax.random.split(key, 6)

    N, in_dim = 256, 256

    # symmetric, scaled dense adjacency; deterministic
    a_rand = jax.random.uniform(k_adj, (N, N), jnp.float32)
    adj = (a_rand + a_rand.T) * (0.5 / N)
    x = jax.random.normal(k_x, (N, in_dim), jnp.float32)

    configs = [
        (256, k_w1, False),   # out_dim == in_dim -> reordered path adj @ (x W^T)
        (96,  k_w2, True),    # out_dim <  in_dim, non-128 multiple -> lane pad + fused bias
        (384, k_w3, False),   # out_dim >  in_dim -> (adj @ x) @ W^T
    ]
    for out_dim, kw, use_bias in configs:
        w = xavier_uniform(kw, out_dim, in_dim)
        bias = (0.1 * jax.random.normal(k_b, (out_dim,), jnp.float32)
                if use_bias else None)

        # reference: dropout(eval)=identity; adj @ x; Linear
        ref = (adj @ x) @ w.T
        if bias is not None:
            ref = ref + bias

        # tk=None: production path (resident B, single K step).
        # tk=128 : small shapes only -- forces the K-streaming accumulation path
        #          (direct-into-o_ref f32 acc + bf16 scratch acc) for coverage.
        for tk in (None, 128):
            out = jax.block_until_ready(graph_conv(adj, x, w, bias, tk=tk))
            assert out.shape == (N, out_dim)
            rel_err = float(jnp.max(jnp.abs(out - ref)) /
                            (jnp.max(jnp.abs(ref)) + 1e-6))
            # bf16 MXU operands with f32 accumulation => loosened tolerance
            assert rel_err < 2e-2, (
                f"mismatch vs reference (out_dim={out_dim}, tk={tk}): {rel_err}")

    print("KERNEL_OK")
</pallas_src>

<mosaic_0001>
module attributes {stable_mosaic.version = 11 : i64} {
  func.func @_mm_kernel(%arg0: i32, %arg1: i32, %arg2: memref<128x256xf32, #tpu.memory_space<vmem>>, %arg3: memref<256x256xbf16, #tpu.memory_space<vmem>>, %arg4: memref<128x256xf32, #tpu.memory_space<vmem>>) attributes {dimension_semantics = [#tpu.dimension_semantics<parallel>, #tpu.dimension_semantics<arbitrary>], iteration_bounds = array<i64: 2, 1>, scalar_prefetch = 0 : i64, scratch_operands = 0 : i64, tpu.core_type = #tpu.core_type<tc>, window_params = [{transform_indices = @transform_0, window_bounds = array<i64: 128, 256>}, {transform_indices = @transform_1, window_bounds = array<i64: 256, 256>}, {transform_indices = @transform_2, window_bounds = array<i64: 128, 256>}]} {
    %c0 = arith.constant 0 : index
    %c0_0 = arith.constant 0 : index
    %0 = vector.load %arg2[%c0, %c0_0] : memref<128x256xf32, #tpu.memory_space<vmem>>, vector<128x256xf32>
    %1 = arith.truncf %0 : vector<128x256xf32> to vector<128x256xbf16>
    %c0_1 = arith.constant 0 : index
    %c0_2 = arith.constant 0 : index
    %2 = vector.load %arg3[%c0_1, %c0_2] : memref<256x256xbf16, #tpu.memory_space<vmem>>, vector<256x256xbf16>
    %cst = arith.constant dense<0.000000e+00> : vector<128x256xf32>
    %3 = tpu.matmul %1, %2, %cst {dimension_numbers = #tpu.dot_dimension_numbers<[1], [0], [0], [1], [0, 0, 1, 1], [], []>} : vector<128x256xbf16>, vector<256x256xbf16>, vector<128x256xf32> -> vector<128x256xf32>
    %c0_3 = arith.constant 0 : index
    %c0_4 = arith.constant 0 : index
    %4 = vector.load %arg4[%c0_3, %c0_4] : memref<128x256xf32, #tpu.memory_space<vmem>>, vector<128x256xf32>
    tpu.vector_store %arg4[%c0_3, %c0_4], %3 {strides = array<i32>} : memref<128x256xf32, #tpu.memory_space<vmem>>, vector<128x256xf32>,
    return
  }
  func.func @transform_0(%arg0: i32, %arg1: i32) -> (i32, i32) {
    %c0_i32 = arith.constant 0 : i32
    return %arg0, %arg1 : i32, i32
  }
  func.func @transform_1(%arg0: i32, %arg1: i32) -> (i32, i32) {
    %c0_i32 = arith.constant 0 : i32
    %c0_i32_0 = arith.constant 0 : i32
    return %arg1, %c0_i32 : i32, i32
  }
  func.func @transform_2(%arg0: i32, %arg1: i32) -> (i32, i32) {
    %c0_i32 = arith.constant 0 : i32
    %c0_i32_0 = arith.constant 0 : i32
    return %arg0, %c0_i32 : i32, i32
  }
}

module attributes {stable_mosaic.version = 11 : i64} {
  func.func @_mm_kernel(%arg0: i32, %arg1: i32, %arg2: memref<128x256xf32, #tpu.memory_space<vmem>>, %arg3: memref<256x256xf32, #tpu.memory_space<vmem>>, %arg4: memref<128x256xbf16, #tpu.memory_space<vmem>>) attributes {dimension_semantics = [#tpu.dimension_semantics<parallel>, #tpu.dimension_semantics<arbitrary>], iteration_bounds = array<i64: 2, 1>, scalar_prefetch = 0 : i64, scratch_operands = 0 : i64, tpu.core_type = #tpu.core_type<tc>, window_params = [{transform_indices = @transform_0, window_bounds = array<i64: 128, 256>}, {transform_indices = @transform_1, window_bounds = array<i64: 256, 256>}, {transform_indices = @transform_2, window_bounds = array<i64: 128, 256>}]} {
    %c0 = arith.constant 0 : index
    %c0_0 = arith.constant 0 : index
    %0 = vector.load %arg2[%c0, %c0_0] : memref<128x256xf32, #tpu.memory_space<vmem>>, vector<128x256xf32>
    %1 = arith.truncf %0 : vector<128x256xf32> to vector<128x256xbf16>
    %c0_1 = arith.constant 0 : index
    %c0_2 = arith.constant 0 : index
    %2 = vector.load %arg3[%c0_1, %c0_2] : memref<256x256xf32, #tpu.memory_space<vmem>>, vector<256x256xf32>
    %3 = arith.truncf %2 : vector<256x256xf32> to vector<256x256xbf16>
    %cst = arith.constant dense<0.000000e+00> : vector<128x256xf32>
    %4 = tpu.matmul %1, %3, %cst {dimension_numbers = #tpu.dot_dimension_numbers<[1], [0], [0], [1], [0, 0, 1, 1], [], []>} : vector<128x256xbf16>, vector<256x256xbf16>, vector<128x256xf32> -> vector<128x256xf32>
    %5 = arith.truncf %4 : vector<128x256xf32> to vector<128x256xbf16>
    %c0_3 = arith.constant 0 : index
    %c0_4 = arith.constant 0 : index
    %6 = vector.load %arg4[%c0_3, %c0_4] : memref<128x256xbf16, #tpu.memory_space<vmem>>, vector<128x256xbf16>
    tpu.vector_store %arg4[%c0_3, %c0_4], %5 {strides = array<i32>} : memref<128x256xbf16, #tpu.memory_space<vmem>>, vector<128x256xbf16>,
    return
  }
  func.func @transform_0(%arg0: i32, %arg1: i32) -> (i32, i32) {
    %c0_i32 = arith.constant 0 : i32
    return %arg0, %arg1 : i32, i32
  }
  func.func @transform_1(%arg0: i32, %arg1: i32) -> (i32, i32) {
    %c0_i32 = arith.constant 0 : i32
    %c0_i32_0 = arith.constant 0 : i32
    return %arg1, %c0_i32 : i32, i32
  }
  func.func @transform_2(%arg0: i32, %arg1: i32) -> (i32, i32) {
    %c0_i32 = arith.constant 0 : i32
    %c0_i32_0 = arith.constant 0 : i32
    return %arg0, %c0_i32 : i32, i32
  }
}

</mosaic_0001>

<bundles_post_ra>
// kernel: graph_conv.3
= control target key start
LH: loop header
LB: loop body
LE: loop exit
PB: predicated region body
PF: predicated region fallthrough
CT: control target
= control target key end

     0   :  { %7 = vsyncpa [#allocation3], 0  ;;  %s1258_s0 = inlined_call_operand.vmem [shape: f32[256,256], index: 0, kind: input, shape index: {}]   ;;  %s1259_s1 = inlined_call_operand.vmem [shape: bf16[256,256], index: 1, kind: input, shape index: {}]   ;;  %s1260_s2 = inlined_call_operand.hbm [shape: f32[256,256], index: 2, kind: output, shape index: {}]  }
   0x1   :  { %9 = vsyncpa [#allocation3 + $0x1], 0  ;;  %s976_s9 = smov 0   ;;  %s978_s10 = smov 0  }
   0x2   :  { %s980_s11 = smov 0   ;;  %s982_s12 = smov 0  }
   0x3   :  { %s984_s13 = smov 0   ;;  %s986_s14 = smov 0  }
   0x4 LB: > { %s692_s15 = sadd.s32 4294967295, %s956_s14   ;;  %s693_s16 = sadd.s32 4294967294, %s956_s14   ;;  %s956_s14 = sphi %s986_s14, %s15_s14   ;;  %s952_s13 = sphi %s984_s13, %s1267_s13   ;;  %s948_s12 = sphi %s982_s12, %s1266_s12   ;;  %s944_s11 = sphi %s980_s11, %s1265_s11   ;;  %s940_s10 = sphi %s978_s10, %s1264_s10   ;;  %s936_s9 = sphi %s976_s9, %s1263_s9  }
   0x5   : > { %s27_s17 = sadd.s32 1, %s952_s13  ;;  %s88_s18 = sadd.s32 1, %s944_s11 }
   0x6   : > { %p29_p0 = scmp.ge.s32.totalorder %s27_s17, 2  ;;  %p98_p1 = scmp.ne.s32.totalorder %s944_s11, %s940_s10 }
   0x7   : > { %p99_p2 = scmp.eq.s32.totalorder %s692_s15, 1  ;;  %p104_p3 = scmp.ne.s32.totalorder %s940_s10, %s936_s9 }
   0x8   : > { %s1269_s17 = smov (%p29_p0, %s27_s17), 0  ;;  %p105_p5 = scmp.eq.s32.totalorder %s693_s16, 1 }
   0x9   : > { %p1016_p4 = por %p99_p2, %p98_p1  ;;  %s85_s20 = ssub.s32 %s952_s13, %s1269_s17 }
   0xa   : > { %p697_p6 = scmp.ge.s32.totalorder %s956_s14, 1  ;;  %p86_p7 = scmp.eq.s32.totalorder %s85_s20, 0 }
   0xb   : > { %p1023_p8 = por %p105_p5, %p104_p3  ;;  %p148_p9 = scmp.lt.s32.totalorder %s956_s14, 3 }
   0xc   : > { %s1029_s22 = scalar_select %p86_p7, %s944_s11, %s88_s18  }
   0xd   : > { %p149_p10 = pnand %p697_p6, %p148_p9 }
   0xe   : > { %s699_s5 = sshll.u32 (!%p149_p10), %s948_s12, 4  ;;  %s178_s20 = sand.u32 (!%p149_p10), 1, %s940_s10  }
   0xf   : > { %152 = sbr.rel (%p149_p10) target bundleno = 322 (0x142), region = 28  ;;  %p183_p11 = scmp.lt.s32.totalorder (!%p149_p10), %s699_s5, 31 }
  0x10   : > { %s698_s23 = sshll.u32 (!%p149_p10), %s178_s20, 8  ;;  %s958_s30 = smov (!%p149_p10), [#allocation2]  }
  0x11   : > { %s1168_s24 = scalar_lea.vmem (!%p149_p10), [#allocation2], %s698_s23  ;;  %s884_s4 = sshll.u32 (!%p149_p10), %s958_s30, 4  ;;  %s885_s4 = int_to_ptr.vmem [resolvable:$false] %s884_s4 }
  0x12   : > { %s601_s25 = sshll.u32 (!%p149_p10), %s1168_s24, 4  ;;  %s886_s6 = scalar_lea.vmem (!%p149_p10), %s885_s4, 8192  ;;  %s1205_s25 = int_to_ptr.vmem [resolvable:$true] %s601_s25 }
  0x13   : > { %s880_s29 = scalar_lea.vmem (!%p149_p10), %s1205_s25, 4096  ;;  %p887_p1 = scmp.lt.s32.totalorder (!%p149_p10), %s1205_s25, %s885_s4 }
  0x14   : > { %v832_v0 = vld [vmem:[%s1259_s1 + $0x74] ss:$8 sps:$4 sm:$0xff]   ;;  %v834_v1 = vld [vmem:[%s1259_s1 + $0x70] ss:$8 sps:$4 sm:$0xff]   ;;  %v835_v2 = vld [vmem:[%s1259_s1 + $0x64] ss:$8 sps:$4 sm:$0xff]   ;;  %p881_p12 = scmp.ne.s32.totalorder %s1205_s25, %s880_s29  ;;  %p888_p2 = scmp.lt.s32.totalorder %s886_s6, %s880_s29 }
  0x15   : > { %441 = vmatprep.subr.bf16.mxu0 %v832_v0  ;;  %743 = vmatprep.subr.bf16.mxu1 %v832_v0  ;;  %v837_v3 = vld [vmem:[%s1259_s1 + $0x60] ss:$8 sps:$4 sm:$0xff]   ;;  %v838_v4 = vld [vmem:[%s1259_s1 + $0x54] ss:$8 sps:$4 sm:$0xff]   ;;  %v840_v5 = vld [vmem:[%s1259_s1 + $0x50] ss:$8 sps:$4 sm:$0xff]  }
  0x16   : > { %442 = vmatpush1.bf16.msra.mxu0 %v834_v1  ;;  %759 = vmatpush1.bf16.msra.mxu1 %v834_v1  ;;  %v841_v6 = vld [vmem:[%s1259_s1 + $0x44] ss:$8 sps:$4 sm:$0xff]   ;;  %v843_v7 = vld [vmem:[%s1259_s1 + $0x40] ss:$8 sps:$4 sm:$0xff]   ;;  %s1271_s5 = smov (!%p183_p11, %s699_s5), 31  ;;  %p882_p13 = pnand %p881_p12, %p1016_p4 }
  0x17   : > { %443 = vmatprep.subr.bf16.mxu0 %v835_v2  ;;  %744 = vmatprep.subr.bf16.mxu1 %v835_v2  ;;  %v844_v8 = vld [vmem:[%s1259_s1 + $0x34] ss:$8 sps:$4 sm:$0xff]   ;;  %v846_v9 = vld [vmem:[%s1259_s1 + $0x30] ss:$8 sps:$4 sm:$0xff]   ;;  %s740_s26 = sshll.u32 %s1271_s5, 4  ;;  %p889_p3 = por %p888_p2, %p887_p1 }
  0x18   : > { %v847_v10 = vld [vmem:[%s1259_s1 + $0x24] ss:$8 sps:$4 sm:$0xff]   ;;  %s1068_s3 = scalar_lea.vmem %s1258_s0, %s740_s26  ;;  %v849_v11 = vld [vmem:[%s1259_s1 + $0x20] ss:$8 sps:$4 sm:$0xff]   ;;  %v850_v12 = vld [vmem:[%s1259_s1 + $0x14] ss:$8 sps:$4 sm:$0xff]   ;;  %p883_p0 = pneg %p882_p13 }
  0x19   : > { %v202_v13 = vld [vmem:[%s1068_s3 + $0x8] sm:$0xff]  ;;  %v204_v14 = vld [vmem:[%s1068_s3 + $0x18] sm:$0xff]  ;;  %v201_v38 = vld [vmem:[%s1068_s3] sm:$0xff] }
  0x1a   : > { %444 = vmatpush1.bf16.msra.mxu0 %v837_v3  ;;  %760 = vmatpush1.bf16.msra.mxu1 %v837_v3  ;;  %v234_v15 = vpack.c.bf16 %v204_v14, %v202_v13  ;;  %v218_v16 = vld [vmem:[%s1068_s3 + $0x88] sm:$0xff]  ;;  %v220_v17 = vld [vmem:[%s1068_s3 + $0x98] sm:$0xff]  ;;  %v203_v39 = vld [vmem:[%s1068_s3 + $0x10] sm:$0xff]  ;;  %p890_p5 = pnand %p889_p3, %p883_p0 }
  0x1b   : > { %445 = vmatprep.subr.bf16.mxu0 %v838_v4  ;;  %745 = vmatprep.subr.bf16.mxu1 %v838_v4  ;;  %v852_v18 = vld [vmem:[%s1259_s1 + $0x10] ss:$8 sps:$4 sm:$0xff]   ;;  %v242_v19 = vpack.c.bf16 %v220_v17, %v218_v16  ;;  %v853_v20 = vld [vmem:[%s1259_s1 + $0x4] ss:$8 sps:$4 sm:$0xff]   ;;  %v855_v21 = vld [vmem:[%s1259_s1] ss:$8 sps:$4 sm:$0xff]   ;;  %v233_v46 = vpack.c.bf16 %v203_v39, %v201_v38 }
  0x1c   : > { %473 = vmatprep.mubr.bf16.mxu0 %v234_v15  ;;  %v856_v22 = vld [vmem:[%s1259_s1 + $0xf4] ss:$8 sps:$4 sm:$0xff]   ;;  %v858_v23 = vld [vmem:[%s1259_s1 + $0xf0] ss:$8 sps:$4 sm:$0xff]   ;;  %v859_v24 = vld [vmem:[%s1259_s1 + $0xe4] ss:$8 sps:$4 sm:$0xff]  }
  0x1d   : > { %513 = vmatprep.mubr.bf16.mxu1 %v242_v19  ;;  %v861_v25 = vld [vmem:[%s1259_s1 + $0xe0] ss:$8 sps:$4 sm:$0xff]   ;;  %v862_v26 = vld [vmem:[%s1259_s1 + $0xd4] ss:$8 sps:$4 sm:$0xff]   ;;  %v864_v27 = vld [vmem:[%s1259_s1 + $0xd0] ss:$8 sps:$4 sm:$0xff]  }
  0x1e   : > { %446 = vmatpush1.bf16.msra.mxu0 %v840_v5  ;;  %761 = vmatpush1.bf16.msra.mxu1 %v840_v5  ;;  %v865_v28 = vld [vmem:[%s1259_s1 + $0xc4] ss:$8 sps:$4 sm:$0xff]   ;;  %v867_v29 = vld [vmem:[%s1259_s1 + $0xc0] ss:$8 sps:$4 sm:$0xff]   ;;  %v868_v30 = vld [vmem:[%s1259_s1 + $0xb4] ss:$8 sps:$4 sm:$0xff]  }
  0x1f   : > { %447 = vmatprep.subr.bf16.mxu0 %v841_v6  ;;  %746 = vmatprep.subr.bf16.mxu1 %v841_v6  ;;  %v870_v31 = vld [vmem:[%s1259_s1 + $0xb0] ss:$8 sps:$4 sm:$0xff]   ;;  %v871_v32 = vld [vmem:[%s1259_s1 + $0xa4] ss:$8 sps:$4 sm:$0xff]   ;;  %v873_v33 = vld [vmem:[%s1259_s1 + $0xa0] ss:$8 sps:$4 sm:$0xff]  }
  0x20   : > { %v874_v34 = vld [vmem:[%s1259_s1 + $0x94] ss:$8 sps:$4 sm:$0xff]   ;;  %v876_v35 = vld [vmem:[%s1259_s1 + $0x90] ss:$8 sps:$4 sm:$0xff]   ;;  %v877_v36 = vld [vmem:[%s1259_s1 + $0x84] ss:$8 sps:$4 sm:$0xff]  }
  0x21   : > { %v879_v37 = vld [vmem:[%s1259_s1 + $0x80] ss:$8 sps:$4 sm:$0xff]   ;;  %v219_v41 = vld [vmem:[%s1068_s3 + $0x90] sm:$0xff]  ;;  %v208_v43 = vld [vmem:[%s1068_s3 + $0x38] sm:$0xff] }
  0x22   : > { %448 = vmatpush1.bf16.msra.mxu0 %v843_v7  ;;  %762 = vmatpush1.bf16.msra.mxu1 %v843_v7  ;;  %v217_v40 = vld [vmem:[%s1068_s3 + $0x80] sm:$0xff]  ;;  %v206_v42 = vld [vmem:[%s1068_s3 + $0x28] sm:$0xff]  ;;  %v224_v45 = vld [vmem:[%s1068_s3 + $0xb8] sm:$0xff] }
  0x23   : > { %449 = vmatprep.subr.bf16.mxu0 %v844_v8  ;;  %747 = vmatprep.subr.bf16.mxu1 %v844_v8  ;;  %v222_v44 = vld [vmem:[%s1068_s3 + $0xa8] sm:$0xff]  ;;  %v241_v47 = vpack.c.bf16 %v219_v41, %v217_v40  ;;  %v236_v48 = vpack.c.bf16 %v208_v43, %v206_v42  ;;  %v205_v50 = vld [vmem:[%s1068_s3 + $0x20] sm:$0xff]  ;;  %v207_v51 = vld [vmem:[%s1068_s3 + $0x30] sm:$0xff] }
  0x24   : > { %v244_v49 = vpack.c.bf16 %v224_v45, %v222_v44  ;;  %v221_v52 = vld [vmem:[%s1068_s3 + $0xa0] sm:$0xff]  ;;  %v223_v53 = vld [vmem:[%s1068_s3 + $0xb0] sm:$0xff]  ;;  %v210_v54 = vld [vmem:[%s1068_s3 + $0x48] sm:$0xff]  ;;  %v235_v58 = vpack.c.bf16 %v207_v51, %v205_v50 }
  0x25   : > { %v212_v55 = vld [vmem:[%s1068_s3 + $0x58] sm:$0xff]  ;;  %v226_v56 = vld [vmem:[%s1068_s3 + $0xc8] sm:$0xff]  ;;  %v243_v59 = vpack.c.bf16 %v223_v53, %v221_v52  ;;  %v209_v62 = vld [vmem:[%s1068_s3 + $0x40] sm:$0xff] }
  0x26   : > { %450 = vmatpush1.bf16.msra.mxu0 %v846_v9  ;;  %763 = vmatpush1.bf16.msra.mxu1 %v846_v9  ;;  %v228_v57 = vld [vmem:[%s1068_s3 + $0xd8] sm:$0xff]  ;;  %v238_v60 = vpack.c.bf16 %v212_v55, %v210_v54  ;;  %v211_v63 = vld [vmem:[%s1068_s3 + $0x50] sm:$0xff]  ;;  %v225_v0 = vld [vmem:[%s1068_s3 + $0xc0] sm:$0xff] }
  0x27   : > { %451 = vmatprep.subr.bf16.mxu0 %v847_v10  ;;  %748 = vmatprep.subr.bf16.mxu1 %v847_v10  ;;  %v246_v61 = vpack.c.bf16 %v228_v57, %v226_v56  ;;  %v227_v1 = vld [vmem:[%s1068_s3 + $0xd0] sm:$0xff]  ;;  %v214_v2 = vld [vmem:[%s1068_s3 + $0x68] sm:$0xff]  ;;  %v216_v3 = vld [vmem:[%s1068_s3 + $0x78] sm:$0xff]  ;;  %v237_v6 = vpack.c.bf16 %v211_v63, %v209_v62 }
  0x28   : > { %v230_v4 = vld [vmem:[%s1068_s3 + $0xe8] sm:$0xff]  ;;  %v232_v5 = vld [vmem:[%s1068_s3 + $0xf8] sm:$0xff]  ;;  %v245_v7 = vpack.c.bf16 %v227_v1, %v225_v0  ;;  %v240_v8 = vpack.c.bf16 %v216_v3, %v214_v2  ;;  %v213_v10 = vld [vmem:[%s1068_s3 + $0x60] sm:$0xff] }
  0x29   : > { %v248_v9 = vpack.c.bf16 %v232_v5, %v230_v4  ;;  %v231_v13 = vld [vmem:[%s1068_s3 + $0xf0] sm:$0xff] }
  0x2a   : > { %452 = vmatpush1.bf16.msra.mxu0 %v849_v11  ;;  %764 = vmatpush1.bf16.msra.mxu1 %v849_v11  ;;  %v215_v11 = vld [vmem:[%s1068_s3 + $0x70] sm:$0xff] }
  0x2b   : > { %453 = vmatprep.subr.bf16.mxu0 %v850_v12  ;;  %749 = vmatprep.subr.bf16.mxu1 %v850_v12  ;;  %v229_v12 = vld [vmem:[%s1068_s3 + $0xe0] sm:$0xff]  ;;  %v239_v14 = vpack.c.bf16 %v215_v11, %v213_v10  ;;  %s742_s3 = sshll.u32 %s948_s12, 12  ;;  %s1213_s12 = scalar_lea.sflag [#allocation3], %s178_s20 }
  0x2c   : > { %v247_v15 = vpack.c.bf16 %v231_v13, %v229_v12  ;;  %s1203_s28 = scalar_lea.hbm %s1260_s2, %s742_s3 }
  0x2e   : > { %454 = vmatpush1.bf16.msra.mxu0 %v852_v18  ;;  %765 = vmatpush1.bf16.msra.mxu1 %v852_v18 }
  0x2f   : > { %455 = vmatprep.subr.bf16.mxu0 %v853_v20  ;;  %750 = vmatprep.subr.bf16.mxu1 %v853_v20 }
  0x32   : > { %456 = vmatpush1.bf16.msra.mxu0 %v855_v21  ;;  %766 = vmatpush1.bf16.msra.mxu1 %v855_v21 }
  0x33   : > { %457 = vmatprep.subr.bf16.mxu0 %v856_v22  ;;  %751 = vmatprep.subr.bf16.mxu1 %v856_v22 }
  0x36   : > { %458 = vmatpush2.bf16.msra.mxu0 %v858_v23  ;;  %767 = vmatpush2.bf16.msra.mxu1 %v858_v23 }
  0x37   : > { %459 = vmatprep.subr.bf16.mxu0 %v859_v24  ;;  %752 = vmatprep.subr.bf16.mxu1 %v859_v24 }
  0x3a   : > { %460 = vmatpush2.bf16.msra.mxu0 %v861_v25  ;;  %768 = vmatpush2.bf16.msra.mxu1 %v861_v25 }
  0x3b   : > { %461 = vmatprep.subr.bf16.mxu0 %v862_v26  ;;  %753 = vmatprep.subr.bf16.mxu1 %v862_v26 }
  0x3e   : > { %462 = vmatpush2.bf16.msra.mxu0 %v864_v27  ;;  %769 = vmatpush2.bf16.msra.mxu1 %v864_v27 }
  0x3f   : > { %463 = vmatprep.subr.bf16.mxu0 %v865_v28  ;;  %754 = vmatprep.subr.bf16.mxu1 %v865_v28 }
  0x42   : > { %464 = vmatpush2.bf16.msra.mxu0 %v867_v29  ;;  %770 = vmatpush2.bf16.msra.mxu1 %v867_v29 }
  0x43   : > { %465 = vmatprep.subr.bf16.mxu0 %v868_v30  ;;  %755 = vmatprep.subr.bf16.mxu1 %v868_v30 }
  0x46   : > { %466 = vmatpush2.bf16.msra.mxu0 %v870_v31  ;;  %771 = vmatpush2.bf16.msra.mxu1 %v870_v31 }
  0x47   : > { %467 = vmatprep.subr.bf16.mxu0 %v871_v32  ;;  %756 = vmatprep.subr.bf16.mxu1 %v871_v32 }
  0x4a   : > { %468 = vmatpush2.bf16.msra.mxu0 %v873_v33  ;;  %772 = vmatpush2.bf16.msra.mxu1 %v873_v33 }
  0x4b   : > { %469 = vmatprep.subr.bf16.mxu0 %v874_v34  ;;  %757 = vmatprep.subr.bf16.mxu1 %v874_v34 }
  0x4e   : > { %470 = vmatpush2.bf16.msra.mxu0 %v876_v35  ;;  %773 = vmatpush2.bf16.msra.mxu1 %v876_v35 }
  0x4f   : > { %471 = vmatprep.subr.bf16.mxu0 %v877_v36  ;;  %758 = vmatprep.subr.bf16.mxu1 %v877_v36 }
  0x52   : > { %472 = vmatpush2.bf16.msra.mxu0 %v879_v37  ;;  %774 = vmatpush2.bf16.msra.mxu1 %v879_v37 }
  0x55   : > { %474 = vmatmul.mubr.bf16.vlgmr.msra.gmra.mxu0 %v233_v46  ;;  %514 = vmatmul.mubr.bf16.vlgmr.msra.gmra.mxu1 %v241_v47 }
  0x56   : > { %483 = vmatprep.mubr.bf16.mxu0 %v236_v48  ;;  %523 = vmatprep.mubr.bf16.mxu1 %v244_v49 }
  0x5d   : > { %484 = vmatmul.mubr.bf16.gmra.mxu0 %v235_v58  ;;  %524 = vmatmul.mubr.bf16.gmra.mxu1 %v243_v59 }
  0x5e   : > { %493 = vmatprep.mubr.bf16.mxu0 %v238_v60  ;;  %533 = vmatprep.mubr.bf16.mxu1 %v246_v61 }
  0x65   : > { %494 = vmatmul.mubr.bf16.gmra.mxu0 %v237_v6  ;;  %534 = vmatmul.mubr.bf16.gmra.mxu1 %v245_v7 }
  0x66   : > { %503 = vmatprep.mubr.bf16.mxu0 %v240_v8  ;;  %543 = vmatprep.mubr.bf16.mxu1 %v248_v9 }
  0x6d   : > { %504 = vmatmul.mubr.bf16.gmra.mxu0 %v239_v14  ;;  %544 = vmatmul.mubr.bf16.gmra.mxu1 %v247_v15 }
 0x115   : > { %v475_v16 = vpop.f32.mrf.mxu0  ;;  %v515_v17 = vpop.f32.mrf.mxu1 }
 0x116   : > { %554 = vst [vmem:[%s1168_s24] sm:$0xff] %v475_v16  ;;  %570 = vst [vmem:[%s1168_s24 + $0x80] sm:$0xff] %v515_v17 }
 0x117   : > { %v477_v18 = vpop.f32.mrf.mxu0  ;;  %v517_v19 = vpop.f32.mrf.mxu1 }
 0x118   : > { %555 = vst [vmem:[%s1168_s24 + $0x8] sm:$0xff] %v477_v18  ;;  %571 = vst [vmem:[%s1168_s24 + $0x88] sm:$0xff] %v517_v19 }
 0x119   : > { %v479_v20 = vpop.f32.mrf.mxu0  ;;  %v519_v21 = vpop.f32.mrf.mxu1 }
 0x11a   : > { %556 = vst [vmem:[%s1168_s24 + $0x10] sm:$0xff] %v479_v20  ;;  %572 = vst [vmem:[%s1168_s24 + $0x90] sm:$0xff] %v519_v21 }
 0x11b   : > { %v481_v22 = vpop.f32.mrf.mxu0  ;;  %v521_v23 = vpop.f32.mrf.mxu1 }
 0x11c   : > { %557 = vst [vmem:[%s1168_s24 + $0x18] sm:$0xff] %v481_v22  ;;  %573 = vst [vmem:[%s1168_s24 + $0x98] sm:$0xff] %v521_v23 }
 0x11d   : > { %v485_v24 = vpop.f32.mrf.mxu0  ;;  %v525_v25 = vpop.f32.mrf.mxu1 }
 0x11e   : > { %558 = vst [vmem:[%s1168_s24 + $0x20] sm:$0xff] %v485_v24  ;;  %574 = vst [vmem:[%s1168_s24 + $0xa0] sm:$0xff] %v525_v25 }
 0x11f   : > { %v487_v26 = vpop.f32.mrf.mxu0  ;;  %v527_v27 = vpop.f32.mrf.mxu1 }
 0x120   : > { %559 = vst [vmem:[%s1168_s24 + $0x28] sm:$0xff] %v487_v26  ;;  %575 = vst [vmem:[%s1168_s24 + $0xa8] sm:$0xff] %v527_v27 }
 0x121   : > { %v489_v28 = vpop.f32.mrf.mxu0  ;;  %v529_v29 = vpop.f32.mrf.mxu1 }
 0x122   : > { %560 = vst [vmem:[%s1168_s24 + $0x30] sm:$0xff] %v489_v28  ;;  %576 = vst [vmem:[%s1168_s24 + $0xb0] sm:$0xff] %v529_v29 }
 0x123   : > { %v491_v30 = vpop.f32.mrf.mxu0  ;;  %v531_v31 = vpop.f32.mrf.mxu1 }
 0x124   : > { %561 = vst [vmem:[%s1168_s24 + $0x38] sm:$0xff] %v491_v30  ;;  %577 = vst [vmem:[%s1168_s24 + $0xb8] sm:$0xff] %v531_v31 }
 0x125   : > { %v495_v32 = vpop.f32.mrf.mxu0  ;;  %v535_v33 = vpop.f32.mrf.mxu1 }
 0x126   : > { %562 = vst [vmem:[%s1168_s24 + $0x40] sm:$0xff] %v495_v32  ;;  %578 = vst [vmem:[%s1168_s24 + $0xc0] sm:$0xff] %v535_v33 }
 0x127   : > { %v497_v34 = vpop.f32.mrf.mxu0  ;;  %v537_v35 = vpop.f32.mrf.mxu1 }
 0x128   : > { %563 = vst [vmem:[%s1168_s24 + $0x48] sm:$0xff] %v497_v34  ;;  %579 = vst [vmem:[%s1168_s24 + $0xc8] sm:$0xff] %v537_v35 }
 0x129   : > { %v499_v36 = vpop.f32.mrf.mxu0  ;;  %v539_v37 = vpop.f32.mrf.mxu1 }
 0x12a   : > { %564 = vst [vmem:[%s1168_s24 + $0x50] sm:$0xff] %v499_v36  ;;  %580 = vst [vmem:[%s1168_s24 + $0xd0] sm:$0xff] %v539_v37 }
 0x12b   : > { %v501_v38 = vpop.f32.mrf.mxu0  ;;  %v541_v39 = vpop.f32.mrf.mxu1 }
 0x12c   : > { %565 = vst [vmem:[%s1168_s24 + $0x58] sm:$0xff] %v501_v38  ;;  %581 = vst [vmem:[%s1168_s24 + $0xd8] sm:$0xff] %v541_v39 }
 0x12d   : > { %v505_v40 = vpop.f32.mrf.mxu0  ;;  %v545_v41 = vpop.f32.mrf.mxu1 }
 0x12e   : > { %566 = vst [vmem:[%s1168_s24 + $0x60] sm:$0xff] %v505_v40  ;;  %582 = vst [vmem:[%s1168_s24 + $0xe0] sm:$0xff] %v545_v41 }
 0x12f   : > { %v507_v42 = vpop.f32.mrf.mxu0  ;;  %v547_v43 = vpop.f32.mrf.mxu1 }
 0x130   : > { %567 = vst [vmem:[%s1168_s24 + $0x68] sm:$0xff] %v507_v42  ;;  %583 = vst [vmem:[%s1168_s24 + $0xe8] sm:$0xff] %v547_v43 }
 0x131   : > { %v509_v44 = vpop.f32.mrf.mxu0  ;;  %v549_v45 = vpop.f32.mrf.mxu1 }
 0x132   : > { %568 = vst [vmem:[%s1168_s24 + $0x70] sm:$0xff] %v509_v44  ;;  %584 = vst [vmem:[%s1168_s24 + $0xf0] sm:$0xff] %v549_v45 }
 0x133   : > { %v511_v46 = vpop.f32.mrf.mxu0  ;;  %v551_v47 = vpop.f32.mrf.mxu1 }
 0x134   : > { %569 = vst [vmem:[%s1168_s24 + $0x78] sm:$0xff] %v511_v46  ;;  %585 = vst [vmem:[%s1168_s24 + $0xf8] sm:$0xff] %v551_v47 }
 0x135   : > { %893 = shalt.err (!%p890_p5)
}
 0x136   : > { %s894_s5 = scalar_lea.hbm %s1203_s28, 4096  ;;  %s898_s15 = scalar_lea.hbm %s1260_s2, 8192 }
 0x137   : > { %p895_p6 = scmp.ne.s32.totalorder %s1203_s28, %s894_s5  ;;  %p899_p10 = scmp.lt.s32.totalorder %s1203_s28, %s1260_s2 }
 0x138   : > { %p900_p11 = scmp.lt.s32.totalorder %s898_s15, %s894_s5 }
 0x139   : > { %p896_p7 = pnand %p895_p6, %p1016_p4 }
 0x13a   : > { %p901_p12 = por %p900_p11, %p899_p10 }
 0x13b   : > { %p897_p9 = pneg %p896_p7 }
 0x13d   : > { %p902_p13 = pnand %p901_p12, %p897_p9 }
 0x13f   : > { %905 = shalt.err (!%p902_p13)
}
 0x140   : > { %s959_s20 = smov 256   ;;  %s960_s23 = smov 16  }
 0x141   : > { %775 = dma.vmem_to_hbm [thread:$0]  (%p1016_p4), %s1205_s25, 4096, %s1203_s28, %s1213_s12, %s959_s20, %s959_s20, %s960_s23  }
 0x142 PF: > { %p781_p0 = scmp.ge.s32.totalorder %s956_s14, 2  ;;  %s616_s24 = sand.u32 1, %s936_s9  }
 0x143   : > { %s617_s3 = scalar_lea.sflag [#allocation3], %s616_s24 }
 0x144   : > { %p778_p1 = pnand %p781_p0, %p1023_p8 }
 0x146   : > { %p779_p2 = pneg %p778_p1 }
 0x148   : > { %931 = dma.done.wait (%p779_p2), %s617_s3, 4096  }
 0x149   : > { %933 = vsyncadd (%p779_p2), %s617_s3, 4294963200  ;;  %s15_s14 = sadd.s32 1, %s956_s14   ;;  %s1263_s9 = smov %s940_s10 }
 0x14a   : > { %p12_p3 = scmp.ge.s32.totalorder %s15_s14, 4   ;;  %s1264_s10 = smov %s944_s11 }
 0x14b   : > { %s1265_s11 = smov %s1029_s22  ;;  %s1266_s12 = smov %s952_s13 }
 0x14c   : > { %s1267_s13 = smov %s1269_s17  ;;  %14 = sbr.rel (!%p12_p3) target bundleno = 4 (0x4), region = 66 }
 0x151   :  { %622 = vsyncpa [#allocation3], 1 }
 0x152   :  { %624 = vsyncpa [#allocation3 + $0x1], 1 }

// kernel: graph_conv.2
= control target key start
LH: loop header
LB: loop body
LE: loop exit
PB: predicated region body
PF: predicated region fallthrough
CT: control target
= control target key end

     0   :  { %s805_s9 = smov 0   ;;  %s807_s10 = smov 0   ;;  %s1089_s0 = inlined_call_operand.vmem [shape: f32[256,256], index: 0, kind: input, shape index: {}]   ;;  %s1090_s1 = inlined_call_operand.vmem [shape: f32[256,256], index: 1, kind: input, shape index: {}]   ;;  %s1091_s2 = inlined_call_operand.vmem [shape: bf16[256,256], index: 2, kind: output, shape index: {}]  }
   0x1   :  { %s809_s11 = smov 0  }
   0x2 LB: > { %s24_s12 = sadd.s32 1, %s784_s10  ;;  %p667_p0 = scmp.ge.s32.totalorder %s788_s11, 1  ;;  %s788_s11 = sphi %s809_s11, %s12_s11   ;;  %s784_s10 = sphi %s807_s10, %s1093_s10   ;;  %s780_s9 = sphi %s805_s9, %s1092_s9  }
   0x3   : > { %p26_p1 = scmp.ge.s32.totalorder %s24_s12, 2  ;;  %p145_p2 = scmp.lt.s32.totalorder %s788_s11, 3 }
   0x5   : > { %s1095_s12 = smov (%p26_p1, %s24_s12), 0  ;;  %p146_p3 = pnand %p667_p0, %p145_p2 }
   0x6   : > { %s668_s5 = sshll.u32 (!%p146_p3), %s780_s9, 4 }
   0x7   : > { %149 = sbr.rel (%p146_p3) target bundleno = 305 (0x131), region = 28  ;;  %p181_p4 = scmp.lt.s32.totalorder (!%p146_p3), %s668_s5, 31 }
   0xc   : > { %v282_v0 = vld [vmem:[%s1090_s1 + $0xe8] sm:$0xff]  ;;  %v284_v1 = vld [vmem:[%s1090_s1 + $0xf8] sm:$0xff]  ;;  %v281_v2 = vld [vmem:[%s1090_s1 + $0xe0] sm:$0xff]  ;;  %s1097_s5 = smov (!%p181_p4, %s668_s5), 31 }
   0xd   : > { %v332_v3 = vpack.c.bf16 %v284_v1, %v282_v0  ;;  %v283_v4 = vld [vmem:[%s1090_s1 + $0xf0] sm:$0xff]  ;;  %v278_v5 = vld [vmem:[%s1090_s1 + $0xc8] sm:$0xff]  ;;  %v280_v6 = vld [vmem:[%s1090_s1 + $0xd8] sm:$0xff]  ;;  %s692_s6 = sshll.u32 %s1097_s5, 4  ;;  %s693_s28 = sshll.u32 %s1097_s5, 3 }
   0xe   : > { %v331_v7 = vpack.c.bf16 %v283_v4, %v281_v2  ;;  %v330_v8 = vpack.c.bf16 %v280_v6, %v278_v5  ;;  %v277_v9 = vld [vmem:[%s1090_s1 + $0xc0] sm:$0xff]  ;;  %v279_v10 = vld [vmem:[%s1090_s1 + $0xd0] sm:$0xff]  ;;  %v274_v11 = vld [vmem:[%s1090_s1 + $0xa8] sm:$0xff]  ;;  %s910_s20 = scalar_lea.vmem %s1089_s0, %s692_s6  ;;  %s1062_s3 = scalar_lea.vmem %s1091_s2, %s693_s28 }
   0xf   : > { %349 = vmatprep.subr.bf16.mxu0 %v332_v3  ;;  %710 = vmatprep.subr.bf16.mxu1 %v332_v3  ;;  %v276_v12 = vld [vmem:[%s1090_s1 + $0xb8] sm:$0xff]  ;;  %v329_v13 = vpack.c.bf16 %v279_v10, %v277_v9  ;;  %v273_v15 = vld [vmem:[%s1090_s1 + $0xa0] sm:$0xff]  ;;  %v275_v16 = vld [vmem:[%s1090_s1 + $0xb0] sm:$0xff] }
  0x10   : > { %350 = vmatpush1.bf16.msra.mxu0 %v331_v7  ;;  %726 = vmatpush1.bf16.msra.mxu1 %v331_v7  ;;  %v328_v14 = vpack.c.bf16 %v276_v12, %v274_v11  ;;  %v270_v17 = vld [vmem:[%s1090_s1 + $0x88] sm:$0xff]  ;;  %v272_v18 = vld [vmem:[%s1090_s1 + $0x98] sm:$0xff]  ;;  %v327_v19 = vpack.c.bf16 %v275_v16, %v273_v15  ;;  %v269_v21 = vld [vmem:[%s1090_s1 + $0x80] sm:$0xff] }
  0x11   : > { %351 = vmatprep.subr.bf16.mxu0 %v330_v8  ;;  %711 = vmatprep.subr.bf16.mxu1 %v330_v8  ;;  %v326_v20 = vpack.c.bf16 %v272_v18, %v270_v17  ;;  %v271_v22 = vld [vmem:[%s1090_s1 + $0x90] sm:$0xff]  ;;  %v266_v23 = vld [vmem:[%s1090_s1 + $0x68] sm:$0xff]  ;;  %v268_v24 = vld [vmem:[%s1090_s1 + $0x78] sm:$0xff] }
  0x12   : > { %v325_v25 = vpack.c.bf16 %v271_v22, %v269_v21  ;;  %v324_v26 = vpack.c.bf16 %v268_v24, %v266_v23  ;;  %v265_v27 = vld [vmem:[%s1090_s1 + $0x60] sm:$0xff]  ;;  %v267_v28 = vld [vmem:[%s1090_s1 + $0x70] sm:$0xff]  ;;  %v262_v29 = vld [vmem:[%s1090_s1 + $0x48] sm:$0xff] }
  0x13   : > { %v264_v30 = vld [vmem:[%s1090_s1 + $0x58] sm:$0xff]  ;;  %v323_v31 = vpack.c.bf16 %v267_v28, %v265_v27  ;;  %v261_v33 = vld [vmem:[%s1090_s1 + $0x40] sm:$0xff]  ;;  %v263_v34 = vld [vmem:[%s1090_s1 + $0x50] sm:$0xff] }
  0x14   : > { %352 = vmatpush1.bf16.msra.mxu0 %v329_v13  ;;  %727 = vmatpush1.bf16.msra.mxu1 %v329_v13  ;;  %v322_v32 = vpack.c.bf16 %v264_v30, %v262_v29  ;;  %v258_v35 = vld [vmem:[%s1090_s1 + $0x28] sm:$0xff]  ;;  %v260_v36 = vld [vmem:[%s1090_s1 + $0x38] sm:$0xff]  ;;  %v321_v37 = vpack.c.bf16 %v263_v34, %v261_v33  ;;  %v257_v38 = vld [vmem:[%s1090_s1 + $0x20] sm:$0xff] }
  0x15   : > { %353 = vmatprep.subr.bf16.mxu0 %v328_v14  ;;  %712 = vmatprep.subr.bf16.mxu1 %v328_v14  ;;  %v259_v39 = vld [vmem:[%s1090_s1 + $0x30] sm:$0xff]  ;;  %v320_v40 = vpack.c.bf16 %v260_v36, %v258_v35  ;;  %v254_v41 = vld [vmem:[%s1090_s1 + $0x8] sm:$0xff]  ;;  %v208_v43 = vld [vmem:[%s910_s20 + $0x18] sm:$0xff] }
  0x16   : > { %v206_v42 = vld [vmem:[%s910_s20 + $0x8] sm:$0xff]  ;;  %v256_v44 = vld [vmem:[%s1090_s1 + $0x18] sm:$0xff]  ;;  %v319_v49 = vpack.c.bf16 %v259_v39, %v257_v38  ;;  %v253_v51 = vld [vmem:[%s1090_s1] sm:$0xff] }
  0x17   : > { %v238_v45 = vpack.c.bf16 %v208_v43, %v206_v42  ;;  %v222_v46 = vld [vmem:[%s910_s20 + $0x88] sm:$0xff]  ;;  %v224_v47 = vld [vmem:[%s910_s20 + $0x98] sm:$0xff]  ;;  %v318_v50 = vpack.c.bf16 %v256_v44, %v254_v41  ;;  %v255_v52 = vld [vmem:[%s1090_s1 + $0x10] sm:$0xff] }
  0x18   : > { %354 = vmatpush1.bf16.msra.mxu0 %v327_v19  ;;  %728 = vmatpush1.bf16.msra.mxu1 %v327_v19  ;;  %v246_v48 = vpack.c.bf16 %v224_v47, %v222_v46  ;;  %v314_v53 = vld [vmem:[%s1090_s1 + $0x1e8] sm:$0xff]  ;;  %v316_v54 = vld [vmem:[%s1090_s1 + $0x1f8] sm:$0xff]  ;;  %v317_v55 = vpack.c.bf16 %v255_v52, %v253_v51  ;;  %v313_v57 = vld [vmem:[%s1090_s1 + $0x1e0] sm:$0xff] }
  0x19   : > { %355 = vmatprep.subr.bf16.mxu0 %v326_v20  ;;  %713 = vmatprep.subr.bf16.mxu1 %v326_v20  ;;  %v348_v56 = vpack.c.bf16 %v316_v54, %v314_v53  ;;  %v315_v58 = vld [vmem:[%s1090_s1 + $0x1f0] sm:$0xff]  ;;  %v310_v59 = vld [vmem:[%s1090_s1 + $0x1c8] sm:$0xff]  ;;  %v312_v60 = vld [vmem:[%s1090_s1 + $0x1d8] sm:$0xff] }
  0x1a   : > { %381 = vmatprep.mubr.bf16.mxu0 %v238_v45  ;;  %421 = vmatprep.mubr.bf16.mxu1 %v246_v48  ;;  %v347_v61 = vpack.c.bf16 %v315_v58, %v313_v57  ;;  %v346_v62 = vpack.c.bf16 %v312_v60, %v310_v59  ;;  %v309_v63 = vld [vmem:[%s1090_s1 + $0x1c0] sm:$0xff]  ;;  %v311_v0 = vld [vmem:[%s1090_s1 + $0x1d0] sm:$0xff]  ;;  %v306_v1 = vld [vmem:[%s1090_s1 + $0x1a8] sm:$0xff] }
  0x1b   : > { %v308_v2 = vld [vmem:[%s1090_s1 + $0x1b8] sm:$0xff]  ;;  %v345_v3 = vpack.c.bf16 %v311_v0, %v309_v63  ;;  %v305_v5 = vld [vmem:[%s1090_s1 + $0x1a0] sm:$0xff]  ;;  %v307_v6 = vld [vmem:[%s1090_s1 + $0x1b0] sm:$0xff] }
  0x1c   : > { %356 = vmatpush1.bf16.msra.mxu0 %v325_v25  ;;  %729 = vmatpush1.bf16.msra.mxu1 %v325_v25  ;;  %v344_v4 = vpack.c.bf16 %v308_v2, %v306_v1  ;;  %v302_v7 = vld [vmem:[%s1090_s1 + $0x188] sm:$0xff]  ;;  %v304_v8 = vld [vmem:[%s1090_s1 + $0x198] sm:$0xff]  ;;  %v343_v9 = vpack.c.bf16 %v307_v6, %v305_v5  ;;  %v301_v11 = vld [vmem:[%s1090_s1 + $0x180] sm:$0xff] }
  0x1d   : > { %357 = vmatprep.subr.bf16.mxu0 %v324_v26  ;;  %714 = vmatprep.subr.bf16.mxu1 %v324_v26  ;;  %v342_v10 = vpack.c.bf16 %v304_v8, %v302_v7  ;;  %v303_v12 = vld [vmem:[%s1090_s1 + $0x190] sm:$0xff]  ;;  %v298_v13 = vld [vmem:[%s1090_s1 + $0x168] sm:$0xff]  ;;  %v300_v14 = vld [vmem:[%s1090_s1 + $0x178] sm:$0xff] }
  0x1e   : > { %v341_v15 = vpack.c.bf16 %v303_v12, %v301_v11  ;;  %v340_v16 = vpack.c.bf16 %v300_v14, %v298_v13  ;;  %v297_v17 = vld [vmem:[%s1090_s1 + $0x160] sm:$0xff]  ;;  %v299_v18 = vld [vmem:[%s1090_s1 + $0x170] sm:$0xff]  ;;  %v294_v19 = vld [vmem:[%s1090_s1 + $0x148] sm:$0xff] }
  0x1f   : > { %v296_v20 = vld [vmem:[%s1090_s1 + $0x158] sm:$0xff]  ;;  %v339_v21 = vpack.c.bf16 %v299_v18, %v297_v17  ;;  %v293_v23 = vld [vmem:[%s1090_s1 + $0x140] sm:$0xff]  ;;  %v295_v24 = vld [vmem:[%s1090_s1 + $0x150] sm:$0xff] }
  0x20   : > { %358 = vmatpush1.bf16.msra.mxu0 %v323_v31  ;;  %730 = vmatpush1.bf16.msra.mxu1 %v323_v31  ;;  %v338_v22 = vpack.c.bf16 %v296_v20, %v294_v19  ;;  %v290_v25 = vld [vmem:[%s1090_s1 + $0x128] sm:$0xff]  ;;  %v292_v26 = vld [vmem:[%s1090_s1 + $0x138] sm:$0xff]  ;;  %v337_v27 = vpack.c.bf16 %v295_v24, %v293_v23  ;;  %v289_v29 = vld [vmem:[%s1090_s1 + $0x120] sm:$0xff] }
  0x21   : > { %359 = vmatprep.subr.bf16.mxu0 %v322_v32  ;;  %715 = vmatprep.subr.bf16.mxu1 %v322_v32  ;;  %v336_v28 = vpack.c.bf16 %v292_v26, %v290_v25  ;;  %v291_v30 = vld [vmem:[%s1090_s1 + $0x130] sm:$0xff]  ;;  %v286_v31 = vld [vmem:[%s1090_s1 + $0x108] sm:$0xff]  ;;  %v288_v32 = vld [vmem:[%s1090_s1 + $0x118] sm:$0xff] }
  0x22   : > { %v335_v33 = vpack.c.bf16 %v291_v30, %v289_v29  ;;  %v334_v34 = vpack.c.bf16 %v288_v32, %v286_v31  ;;  %v285_v35 = vld [vmem:[%s1090_s1 + $0x100] sm:$0xff]  ;;  %v287_v36 = vld [vmem:[%s1090_s1 + $0x110] sm:$0xff]  ;;  %v210_v42 = vld [vmem:[%s910_s20 + $0x28] sm:$0xff] }
  0x23   : > { %v207_v38 = vld [vmem:[%s910_s20 + $0x10] sm:$0xff]  ;;  %v333_v39 = vpack.c.bf16 %v287_v36, %v285_v35  ;;  %v212_v43 = vld [vmem:[%s910_s20 + $0x38] sm:$0xff]  ;;  %v226_v44 = vld [vmem:[%s910_s20 + $0xa8] sm:$0xff] }
  0x24   : > { %360 = vmatpush1.bf16.msra.mxu0 %v321_v37  ;;  %731 = vmatpush1.bf16.msra.mxu1 %v321_v37  ;;  %v205_v37 = vld [vmem:[%s910_s20] sm:$0xff]  ;;  %v223_v41 = vld [vmem:[%s910_s20 + $0x90] sm:$0xff]  ;;  %v228_v45 = vld [vmem:[%s910_s20 + $0xb8] sm:$0xff]  ;;  %v240_v48 = vpack.c.bf16 %v212_v43, %v210_v42 }
  0x25   : > { %361 = vmatprep.subr.bf16.mxu0 %v320_v40  ;;  %716 = vmatprep.subr.bf16.mxu1 %v320_v40  ;;  %v221_v40 = vld [vmem:[%s910_s20 + $0x80] sm:$0xff]  ;;  %v237_v46 = vpack.c.bf16 %v207_v38, %v205_v37  ;;  %v211_v51 = vld [vmem:[%s910_s20 + $0x30] sm:$0xff]  ;;  %v214_v54 = vld [vmem:[%s910_s20 + $0x48] sm:$0xff] }
  0x26   : > { %v245_v47 = vpack.c.bf16 %v223_v41, %v221_v40  ;;  %v225_v52 = vld [vmem:[%s910_s20 + $0xa0] sm:$0xff]  ;;  %v227_v53 = vld [vmem:[%s910_s20 + $0xb0] sm:$0xff]  ;;  %v232_v57 = vld [vmem:[%s910_s20 + $0xd8] sm:$0xff] }
  0x27   : > { %v247_v59 = vpack.c.bf16 %v227_v53, %v225_v52  ;;  %v215_v63 = vld [vmem:[%s910_s20 + $0x50] sm:$0xff]  ;;  %v229_v0 = vld [vmem:[%s910_s20 + $0xc0] sm:$0xff]  ;;  %v218_v2 = vld [vmem:[%s910_s20 + $0x68] sm:$0xff] }
  0x28   : > { %362 = vmatpush1.bf16.msra.mxu0 %v319_v49  ;;  %732 = vmatpush1.bf16.msra.mxu1 %v319_v49  ;;  %v248_v49 = vpack.c.bf16 %v228_v45, %v226_v44  ;;  %v231_v1 = vld [vmem:[%s910_s20 + $0xd0] sm:$0xff]  ;;  %v236_v5 = vld [vmem:[%s910_s20 + $0xf8] sm:$0xff]  ;;  %v233_v12 = vld [vmem:[%s910_s20 + $0xe0] sm:$0xff] }
  0x29   : > { %363 = vmatprep.subr.bf16.mxu0 %v318_v50  ;;  %717 = vmatprep.subr.bf16.mxu1 %v318_v50  ;;  %v209_v50 = vld [vmem:[%s910_s20 + $0x20] sm:$0xff]  ;;  %v249_v7 = vpack.c.bf16 %v231_v1, %v229_v0  ;;  %v219_v11 = vld [vmem:[%s910_s20 + $0x70] sm:$0xff] }
  0x2a   : > { %v239_v58 = vpack.c.bf16 %v211_v51, %v209_v50  ;;  %v235_v13 = vld [vmem:[%s910_s20 + $0xf0] sm:$0xff] }
  0x2c   : > { %364 = vmatpush1.bf16.msra.mxu0 %v317_v55  ;;  %733 = vmatpush1.bf16.msra.mxu1 %v317_v55  ;;  %v216_v55 = vld [vmem:[%s910_s20 + $0x58] sm:$0xff] }
  0x2d   : > { %365 = vmatprep.subr.bf16.mxu0 %v348_v56  ;;  %718 = vmatprep.subr.bf16.mxu1 %v348_v56  ;;  %v230_v56 = vld [vmem:[%s910_s20 + $0xc8] sm:$0xff]  ;;  %v242_v60 = vpack.c.bf16 %v216_v55, %v214_v54 }
  0x30   : > { %366 = vmatpush2.bf16.msra.mxu0 %v347_v61  ;;  %734 = vmatpush2.bf16.msra.mxu1 %v347_v61  ;;  %v250_v61 = vpack.c.bf16 %v232_v57, %v230_v56 }
  0x31   : > { %367 = vmatprep.subr.bf16.mxu0 %v346_v62  ;;  %719 = vmatprep.subr.bf16.mxu1 %v346_v62  ;;  %v213_v62 = vld [vmem:[%s910_s20 + $0x40] sm:$0xff] }
  0x32   : > { %v241_v6 = vpack.c.bf16 %v215_v63, %v213_v62 }
  0x34   : > { %368 = vmatpush2.bf16.msra.mxu0 %v345_v3  ;;  %735 = vmatpush2.bf16.msra.mxu1 %v345_v3  ;;  %v220_v3 = vld [vmem:[%s910_s20 + $0x78] sm:$0xff] }
  0x35   : > { %369 = vmatprep.subr.bf16.mxu0 %v344_v4  ;;  %720 = vmatprep.subr.bf16.mxu1 %v344_v4  ;;  %v234_v4 = vld [vmem:[%s910_s20 + $0xe8] sm:$0xff]  ;;  %v244_v8 = vpack.c.bf16 %v220_v3, %v218_v2 }
  0x38   : > { %370 = vmatpush2.bf16.msra.mxu0 %v343_v9  ;;  %736 = vmatpush2.bf16.msra.mxu1 %v343_v9  ;;  %v252_v9 = vpack.c.bf16 %v236_v5, %v234_v4 }
  0x39   : > { %371 = vmatprep.subr.bf16.mxu0 %v342_v10  ;;  %721 = vmatprep.subr.bf16.mxu1 %v342_v10  ;;  %v217_v10 = vld [vmem:[%s910_s20 + $0x60] sm:$0xff] }
  0x3a   : > { %v243_v14 = vpack.c.bf16 %v219_v11, %v217_v10 }
  0x3c   : > { %372 = vmatpush2.bf16.msra.mxu0 %v341_v15  ;;  %737 = vmatpush2.bf16.msra.mxu1 %v341_v15  ;;  %v251_v15 = vpack.c.bf16 %v235_v13, %v233_v12 }
  0x3d   : > { %373 = vmatprep.subr.bf16.mxu0 %v340_v16  ;;  %722 = vmatprep.subr.bf16.mxu1 %v340_v16 }
  0x40   : > { %374 = vmatpush2.bf16.msra.mxu0 %v339_v21  ;;  %738 = vmatpush2.bf16.msra.mxu1 %v339_v21 }
  0x41   : > { %375 = vmatprep.subr.bf16.mxu0 %v338_v22  ;;  %723 = vmatprep.subr.bf16.mxu1 %v338_v22 }
  0x44   : > { %376 = vmatpush2.bf16.msra.mxu0 %v337_v27  ;;  %739 = vmatpush2.bf16.msra.mxu1 %v337_v27 }
  0x45   : > { %377 = vmatprep.subr.bf16.mxu0 %v336_v28  ;;  %724 = vmatprep.subr.bf16.mxu1 %v336_v28 }
  0x48   : > { %378 = vmatpush2.bf16.msra.mxu0 %v335_v33  ;;  %740 = vmatpush2.bf16.msra.mxu1 %v335_v33 }
  0x49   : > { %379 = vmatprep.subr.bf16.mxu0 %v334_v34  ;;  %725 = vmatprep.subr.bf16.mxu1 %v334_v34 }
  0x4c   : > { %380 = vmatpush2.bf16.msra.mxu0 %v333_v39  ;;  %741 = vmatpush2.bf16.msra.mxu1 %v333_v39 }
  0x4f   : > { %382 = vmatmul.mubr.bf16.vlgmr.msra.gmra.mxu0 %v237_v46  ;;  %422 = vmatmul.mubr.bf16.vlgmr.msra.gmra.mxu1 %v245_v47 }
  0x50   : > { %391 = vmatprep.mubr.bf16.mxu0 %v240_v48  ;;  %431 = vmatprep.mubr.bf16.mxu1 %v248_v49 }
  0x57   : > { %392 = vmatmul.mubr.bf16.gmra.mxu0 %v239_v58  ;;  %432 = vmatmul.mubr.bf16.gmra.mxu1 %v247_v59 }
  0x58   : > { %401 = vmatprep.mubr.bf16.mxu0 %v242_v60  ;;  %441 = vmatprep.mubr.bf16.mxu1 %v250_v61 }
  0x5f   : > { %402 = vmatmul.mubr.bf16.gmra.mxu0 %v241_v6  ;;  %442 = vmatmul.mubr.bf16.gmra.mxu1 %v249_v7 }
  0x60   : > { %411 = vmatprep.mubr.bf16.mxu0 %v244_v8  ;;  %451 = vmatprep.mubr.bf16.mxu1 %v252_v9 }
  0x67   : > { %412 = vmatmul.mubr.bf16.gmra.mxu0 %v243_v14  ;;  %452 = vmatmul.mubr.bf16.gmra.mxu1 %v251_v15 }
 0x10f   : > { %v383_v16 = vpop.f32.mrf.mxu0  ;;  %v423_v17 = vpop.f32.mrf.mxu1 }
 0x111   : > { %v385_v18 = vpop.f32.mrf.mxu0  ;;  %v425_v19 = vpop.f32.mrf.mxu1 }
 0x112   : > { %v694_v20 = vpack.c.bf16 %v385_v18, %v383_v16  ;;  %v702_v21 = vpack.c.bf16 %v425_v19, %v423_v17 }
 0x113   : > { %v387_v22 = vpop.f32.mrf.mxu0  ;;  %v427_v23 = vpop.f32.mrf.mxu1 }
 0x114   : > { %558 = vst [vmem:[%s1062_s3] sm:$0xff] %v694_v20  ;;  %566 = vst [vmem:[%s1062_s3 + $0x40] sm:$0xff] %v702_v21 }
 0x115   : > { %v389_v24 = vpop.f32.mrf.mxu0  ;;  %v429_v25 = vpop.f32.mrf.mxu1 }
 0x116   : > { %v695_v26 = vpack.c.bf16 %v389_v24, %v387_v22  ;;  %v703_v27 = vpack.c.bf16 %v429_v25, %v427_v23 }
 0x117   : > { %v393_v28 = vpop.f32.mrf.mxu0  ;;  %v433_v29 = vpop.f32.mrf.mxu1 }
 0x118   : > { %559 = vst [vmem:[%s1062_s3 + $0x8] sm:$0xff] %v695_v26  ;;  %567 = vst [vmem:[%s1062_s3 + $0x48] sm:$0xff] %v703_v27 }
 0x119   : > { %v395_v30 = vpop.f32.mrf.mxu0  ;;  %v435_v31 = vpop.f32.mrf.mxu1 }
 0x11a   : > { %v696_v32 = vpack.c.bf16 %v395_v30, %v393_v28  ;;  %v704_v33 = vpack.c.bf16 %v435_v31, %v433_v29 }
 0x11b   : > { %v397_v34 = vpop.f32.mrf.mxu0  ;;  %v437_v35 = vpop.f32.mrf.mxu1 }
 0x11c   : > { %560 = vst [vmem:[%s1062_s3 + $0x10] sm:$0xff] %v696_v32  ;;  %568 = vst [vmem:[%s1062_s3 + $0x50] sm:$0xff] %v704_v33 }
 0x11d   : > { %v399_v36 = vpop.f32.mrf.mxu0  ;;  %v439_v37 = vpop.f32.mrf.mxu1 }
 0x11e   : > { %v697_v38 = vpack.c.bf16 %v399_v36, %v397_v34  ;;  %v705_v39 = vpack.c.bf16 %v439_v37, %v437_v35 }
 0x11f   : > { %v403_v40 = vpop.f32.mrf.mxu0  ;;  %v443_v41 = vpop.f32.mrf.mxu1 }
 0x120   : > { %561 = vst [vmem:[%s1062_s3 + $0x18] sm:$0xff] %v697_v38  ;;  %569 = vst [vmem:[%s1062_s3 + $0x58] sm:$0xff] %v705_v39 }
 0x121   : > { %v405_v42 = vpop.f32.mrf.mxu0  ;;  %v445_v43 = vpop.f32.mrf.mxu1 }
 0x122   : > { %v698_v44 = vpack.c.bf16 %v405_v42, %v403_v40  ;;  %v706_v45 = vpack.c.bf16 %v445_v43, %v443_v41 }
 0x123   : > { %v407_v46 = vpop.f32.mrf.mxu0  ;;  %v447_v47 = vpop.f32.mrf.mxu1 }
 0x124   : > { %562 = vst [vmem:[%s1062_s3 + $0x20] sm:$0xff] %v698_v44  ;;  %570 = vst [vmem:[%s1062_s3 + $0x60] sm:$0xff] %v706_v45 }
 0x125   : > { %v409_v48 = vpop.f32.mrf.mxu0  ;;  %v449_v49 = vpop.f32.mrf.mxu1 }
 0x126   : > { %v699_v50 = vpack.c.bf16 %v409_v48, %v407_v46  ;;  %v707_v51 = vpack.c.bf16 %v449_v49, %v447_v47 }
 0x127   : > { %v413_v52 = vpop.f32.mrf.mxu0  ;;  %v453_v53 = vpop.f32.mrf.mxu1 }
 0x128   : > { %563 = vst [vmem:[%s1062_s3 + $0x28] sm:$0xff] %v699_v50  ;;  %571 = vst [vmem:[%s1062_s3 + $0x68] sm:$0xff] %v707_v51 }
 0x129   : > { %v415_v54 = vpop.f32.mrf.mxu0  ;;  %v455_v55 = vpop.f32.mrf.mxu1 }
 0x12a   : > { %v700_v56 = vpack.c.bf16 %v415_v54, %v413_v52  ;;  %v708_v57 = vpack.c.bf16 %v455_v55, %v453_v53 }
 0x12b   : > { %v417_v58 = vpop.f32.mrf.mxu0  ;;  %v457_v59 = vpop.f32.mrf.mxu1 }
 0x12c   : > { %564 = vst [vmem:[%s1062_s3 + $0x30] sm:$0xff] %v700_v56  ;;  %572 = vst [vmem:[%s1062_s3 + $0x70] sm:$0xff] %v708_v57 }
 0x12d   : > { %v419_v60 = vpop.f32.mrf.mxu0  ;;  %v459_v61 = vpop.f32.mrf.mxu1 }
 0x12e   : > { %v701_v62 = vpack.c.bf16 %v419_v60, %v417_v58  ;;  %v709_v63 = vpack.c.bf16 %v459_v61, %v457_v59 }
 0x130   : > { %565 = vst [vmem:[%s1062_s3 + $0x38] sm:$0xff] %v701_v62  ;;  %573 = vst [vmem:[%s1062_s3 + $0x78] sm:$0xff] %v709_v63 }
 0x131 PF: > { %s12_s11 = sadd.s32 1, %s788_s11   ;;  %s1092_s9 = smov %s784_s10 }
 0x132   : > { %p9_p5 = scmp.ge.s32.totalorder %s12_s11, 4   ;;  %s1093_s10 = smov %s1095_s12 }
 0x134   :  { %11 = sbr.rel (!%p9_p5) target bundleno = 2 (0x2), region = 61 }

</bundles_post_ra>
